<compile_context>
chip_gen: v7x
topology: tpu7x:2x2x1
jax: 0.10.0
libtpu: 0.0.40
codegen_flags: <defaults>
</compile_context>

<pallas_src>
import math

import jax
import jax.numpy as jnp
from jax.experimental import pallas as pl
from jax.experimental.pallas import tpu as pltpu


def make_sincos_pe(num_patches: int, dim: int, temperature: float = 10000.0,
                   dtype=jnp.float32) -> jnp.ndarray:
    """Deterministic parameter setup matching PatchPosition2D.__init__ (plain JAX)."""
    assert dim % 4 == 0, "feature dimension must be multiple of 4 for sincos emb"
    h = int(round(math.sqrt(num_patches)))
    assert h * h == num_patches, "num_patches must be a perfect square"
    # torch.meshgrid(arange(h), arange(h), indexing='ij')
    y, x = jnp.meshgrid(jnp.arange(h, dtype=jnp.float32),
                        jnp.arange(h, dtype=jnp.float32), indexing="ij")
    omega = jnp.arange(dim // 4, dtype=jnp.float32) / (dim // 4 - 1)
    omega = 1.0 / (temperature ** omega)
    y = y.reshape(-1)[:, None] * omega[None, :]
    x = x.reshape(-1)[:, None] * omega[None, :]
    pe = jnp.concatenate((jnp.sin(x), jnp.cos(x), jnp.sin(y), jnp.cos(y)), axis=1)
    return pe.astype(dtype)


def _add_pe_kernel(x_ref, pe_ref, o_ref):
    # x_ref : (TM, p*d) VMEM tile of flattened rows
    # pe_ref: (1,  p*d) VMEM-resident table row (same block every grid step)
    o_ref[...] = x_ref[...] + pe_ref[...]   # broadcast over the TM rows


def _choose_tm(rows: int, row_bytes: int,
               target_tile_bytes: int = 4 << 20, cap: int = 2048) -> int:
    """Pick rows-per-tile: big enough to amortize ~0.35us/step grid overhead,
    small enough that 2x(in+out) double-buffered tiles stay well under the
    scoped VMEM limit on every TPU generation."""
    tm = max(8, min(cap, target_tile_bytes // max(1, row_bytes)))
    tm = max(8, (tm // 8) * 8)          # (8,128) sublane constraint
    if tm >= rows:
        if rows >= 16:
            # Split into at least 2 blocks so both v7x TensorCores get work.
            half = (rows + 1) // 2
            tm = min(rows, max(8, ((half + 7) // 8) * 8))
        else:
            tm = rows                    # full-extent block (always legal)
    return tm


def patch_position_2d(x: jnp.ndarray, pe: jnp.ndarray) -> jnp.ndarray:
    """out[b, t] = x[b, t] + pe, done in a Pallas TPU kernel."""
    b, t, p, d = x.shape
    assert pe.shape == (p, d)
    if pe.dtype != x.dtype:
        # Prefer building pe in x.dtype at setup; this is a one-time fallback.
        pe = pe.astype(x.dtype)

    rows, pd = b * t, p * d
    x2 = x.reshape(rows, pd)            # lane-dense: p*d is the lane axis
    pe2 = pe.reshape(1, pd)

    itemsize = jnp.dtype(x.dtype).itemsize
    tm = _choose_tm(rows, pd * itemsize)
    grid = (pl.cdiv(rows, tm),)

    out = pl.pallas_call(
        _add_pe_kernel,
        out_shape=jax.ShapeDtypeStruct((rows, pd), x.dtype),
        grid_spec=pltpu.PrefetchScalarGridSpec(
            num_scalar_prefetch=0,
            grid=grid,
            in_specs=[
                pl.BlockSpec((tm, pd), lambda i: (i, 0)),
                pl.BlockSpec((1, pd), lambda i: (0, 0)),   # constant -> VMEM-resident
            ],
            out_specs=pl.BlockSpec((tm, pd), lambda i: (i, 0)),
        ),
        compiler_params=pltpu.CompilerParams(
            dimension_semantics=("parallel",),
            # ~4x 4MiB tiles double-buffered + tiny pe table; safe on
            # v5e (128 MiB phys), v6e (128 MiB) and v7x (64 MiB).
            vmem_limit_bytes=32 << 20,
        ),
    )(x2, pe2)
    return out.reshape(b, t, p, d)


if __name__ == "__main__":
    # Small shapes consistent with the module:
    #   num_patches = 16 (4x4 grid), dim = 32, batch = 2, t = 3
    num_patches, dim = 16, 32
    b, t = 2, 3

    # Build pe once, already in the activation dtype (cast hoisted to setup).
    pe = make_sincos_pe(num_patches, dim, dtype=jnp.float32)

    key = jax.random.PRNGKey(0)
    x = jax.random.normal(key, (b, t, num_patches, dim), dtype=jnp.float32)

    out = patch_position_2d(x, pe)
    out = jax.block_until_ready(out)

    # Reference check (plain JAX broadcast add)
    ref = x + pe[None, None]
    assert out.shape == (b, t, num_patches, dim)
    assert jnp.allclose(out, ref, atol=1e-6), "mismatch vs reference"

    print("KERNEL_OK")
</pallas_src>

<mosaic_0001>
module attributes {stable_mosaic.version = 11 : i64} {
  func.func @_add_pe_kernel(%arg0: i32, %arg1: memref<6x512xf32, #tpu.memory_space<vmem>>, %arg2: memref<1x512xf32, #tpu.memory_space<vmem>>, %arg3: memref<6x512xf32, #tpu.memory_space<vmem>>) attributes {dimension_semantics = [#tpu.dimension_semantics<parallel>], iteration_bounds = array<i64: 1>, scalar_prefetch = 0 : i64, scratch_operands = 0 : i64, tpu.core_type = #tpu.core_type<tc>, window_params = [{transform_indices = @transform_0, window_bounds = array<i64: 6, 512>}, {pipeline_mode = #tpu.pipeline_mode<synchronous>, transform_indices = @transform_1, window_bounds = array<i64: 1, 512>}, {transform_indices = @transform_2, window_bounds = array<i64: 6, 512>}]} {
    %c0 = arith.constant 0 : index
    %c0_0 = arith.constant 0 : index
    %0 = vector.load %arg1[%c0, %c0_0] : memref<6x512xf32, #tpu.memory_space<vmem>>, vector<6x512xf32>
    %c0_1 = arith.constant 0 : index
    %c0_2 = arith.constant 0 : index
    %1 = vector.load %arg2[%c0_1, %c0_2] : memref<1x512xf32, #tpu.memory_space<vmem>>, vector<1x512xf32>
    %2 = vector.broadcast %1 : vector<1x512xf32> to vector<6x512xf32>
    %3 = arith.addf %0, %2 : vector<6x512xf32>
    %c0_3 = arith.constant 0 : index
    %c0_4 = arith.constant 0 : index
    %4 = vector.load %arg3[%c0_3, %c0_4] : memref<6x512xf32, #tpu.memory_space<vmem>>, vector<6x512xf32>
    tpu.vector_store %arg3[%c0_3, %c0_4], %3 {strides = array<i32>} : memref<6x512xf32, #tpu.memory_space<vmem>>, vector<6x512xf32>,
    return
  }
  func.func @transform_0(%arg0: i32) -> (i32, i32) {
    %c0_i32 = arith.constant 0 : i32
    %c0_i32_0 = arith.constant 0 : i32
    return %arg0, %c0_i32 : i32, i32
  }
  func.func @transform_1(%arg0: i32) -> (i32, i32) {
    %c0_i32 = arith.constant 0 : i32
    %c0_i32_0 = arith.constant 0 : i32
    %c0_i32_1 = arith.constant 0 : i32
    return %c0_i32, %c0_i32_0 : i32, i32
  }
  func.func @transform_2(%arg0: i32) -> (i32, i32) {
    %c0_i32 = arith.constant 0 : i32
    %c0_i32_0 = arith.constant 0 : i32
    return %arg0, %c0_i32 : i32, i32
  }
}

</mosaic_0001>

<bundles_post_ra>
// kernel: tpu_custom_call.1
= control target key start
LH: loop header
LB: loop body
LE: loop exit
PB: predicated region body
PF: predicated region fallthrough
CT: control target
= control target key end

     0   :  { %7 = vsyncpa [#allocation3], 0  ;;  %s215_s0 = inlined_call_operand.hbm [shape: f32[6,512], index: 0, kind: input, shape index: {}]   ;;  %s216_s1 = inlined_call_operand.hbm [shape: f32[1,512], index: 1, kind: input, shape index: {}]   ;;  %s217_s2 = inlined_call_operand.hbm [shape: f32[6,512], index: 2, kind: output, shape index: {}]  }
   0x1   :  { %8 = vsyncpa [#allocation6], 0 }
   0x2   :  { %9 = vsyncpa [#allocation4], 0  ;;  %s161_s9 = smov [#allocation2]   ;;  %s162_s11 = smov [#allocation5]  }
   0x3   :  { %s16_s10 = sshll.u32 %s161_s9, 4  ;;  %s26_s12 = sshll.u32 %s162_s11, 4  ;;  %s17_s10 = int_to_ptr.vmem [resolvable:$true] %s16_s10  ;;  %s27_s12 = int_to_ptr.vmem [resolvable:$true] %s26_s12 }
   0x4   :  { %s89_s15 = scalar_lea.hbm %s215_s0, 512 }
   0x5   :  { %p90_p0 = scmp.ne.s32.totalorder %s215_s0, %s89_s15  ;;  %p93_p1 = scmp.lt.u32.totalorder %s89_s15, %s215_s0 }
   0x7   :  { %p95_p2 = pnand %p93_p1, %p90_p0 }
   0x9   :  { %98 = shalt.err (!%p95_p2)
}
   0xa   :  { %s99_s20 = scalar_lea.vmem %s17_s10, 512  ;;  %p104_p4 = scmp.lt.s32.totalorder %s17_s10, %s17_s10 }
   0xb   :  { %p100_p3 = scmp.ne.s32.totalorder %s17_s10, %s99_s20  ;;  %p105_p5 = scmp.lt.s32.totalorder %s99_s20, %s99_s20 }
   0xd   :  { %p106_p6 = por %p105_p5, %p104_p4 }
   0xf   :  { %p107_p7 = pnand %p106_p6, %p100_p3 }
  0x11   :  { %110 = shalt.err (!%p107_p7)
}
  0x12   :  { %19 = dma.hbm_to_vmem [thread:$0]  %s215_s0, 512, %s17_s10, [#allocation3]  }
  0x13   :  { %s111_s25 = scalar_lea.hbm %s216_s1, 64 }
  0x14   :  { %p112_p8 = scmp.ne.s32.totalorder %s216_s1, %s111_s25  ;;  %p115_p9 = scmp.lt.u32.totalorder %s111_s25, %s216_s1 }
  0x16   :  { %p117_p10 = pnand %p115_p9, %p112_p8 }
  0x18   :  { %120 = shalt.err (!%p117_p10)
}
  0x19   :  { %s121_s30 = scalar_lea.vmem %s27_s12, 64  ;;  %p126_p12 = scmp.lt.s32.totalorder %s27_s12, %s27_s12 }
  0x1a   :  { %p122_p11 = scmp.ne.s32.totalorder %s27_s12, %s121_s30  ;;  %p127_p13 = scmp.lt.s32.totalorder %s121_s30, %s121_s30 }
  0x1c   :  { %p128_p0 = por %p127_p13, %p126_p12 }
  0x1e   :  { %p129_p1 = pnand %p128_p0, %p122_p11 }
  0x20   :  { %132 = shalt.err (!%p129_p1)
}
  0x21   :  { %29 = dma.hbm_to_vmem [thread:$0]  %s216_s1, 64, %s27_s12, [#allocation6]  }
  0x22   :  { %155 = dma.done.wait [#allocation3], 512  }
  0x23   :  { %156 = vsyncadd [#allocation3], 4294966784 }
  0x24   :  { %157 = dma.done.wait [#allocation6], 64  }
  0x25   :  { %158 = vsyncadd [#allocation6], 4294967232  ;;  %v42_v0 = vlaneseq  ;;  %s163_s4 = smov [#allocation7]   ;;  %v36_v6 = vld [vmem:[#allocation2] sm:$0x3f] }
  0x26   :  { %s76_s5 = sshll.u32 %s163_s4, 4  ;;  %v40_v7 = vld [vmem:[#allocation5] sm:$0xf]  ;;  %v37_v8 = vld [vmem:[#allocation2 + $0x8] sm:$0x3f]  ;;  %s77_s5 = int_to_ptr.vmem [resolvable:$true] %s76_s5 }
  0x27   :  { %v43_v1 = vshrl.u32 %v42_v0, 7  ;;  %v38_v11 = vld [vmem:[#allocation2 + $0x10] sm:$0x3f]  ;;  %v39_v13 = vld [vmem:[#allocation2 + $0x18] sm:$0x3f]  ;;  %s133_s1 = scalar_lea.vmem %s77_s5, 512  ;;  %p138_p3 = scmp.lt.s32.totalorder %s77_s5, %s77_s5 }
  0x28   :  { %p134_p2 = scmp.ne.s32.totalorder %s77_s5, %s133_s1  ;;  %p139_p4 = scmp.lt.s32.totalorder %s133_s1, %s133_s1 }
  0x29   :  { %v44_v2 = vsub.s32 0, %v43_v1  ;;  %v48_v3 = vsub.s32 1, %v43_v1  ;;  %v52_v4 = vsub.s32 2, %v43_v1  ;;  %v56_v5 = vsub.s32 3, %v43_v1 }
  0x2a   :  { %p140_p5 = por %p139_p4, %p138_p3 }
  0x2b   :  { %v45_v9 = vrot.slane %v40_v7, %v44_v2  ;;  %v49_v10 = vrot.slane %v40_v7, %v48_v3  ;;  %v53_v12 = vrot.slane %v40_v7, %v52_v4  ;;  %v57_v14 = vrot.slane %v40_v7, %v56_v5 }
  0x2c   :  { %p141_p6 = pnand %p140_p5, %p134_p2 }
  0x2d   :  { %v62_v15 = vadd.f32 %v45_v9, %v36_v6  ;;  %v63_v16 = vadd.f32 %v49_v10, %v37_v8  ;;  %v64_v17 = vadd.f32 %v53_v12, %v38_v11  ;;  %v65_v18 = vadd.f32 %v57_v14, %v39_v13 }
  0x2f   :  { %66 = vst [vmem:[#allocation7] sm:$0x3f] %v62_v15  ;;  %67 = vst [vmem:[#allocation7 + $0x8] sm:$0x3f] %v63_v16 }
  0x30   :  { %68 = vst [vmem:[#allocation7 + $0x10] sm:$0x3f] %v64_v17  ;;  %69 = vst [vmem:[#allocation7 + $0x18] sm:$0x3f] %v65_v18 }
  0x31   :  { %144 = shalt.err (!%p141_p6)
}
  0x32   :  { %s145_s8 = scalar_lea.hbm %s217_s2, 512 }
  0x33   :  { %p146_p7 = scmp.ne.s32.totalorder %s217_s2, %s145_s8  ;;  %p149_p8 = scmp.lt.u32.totalorder %s145_s8, %s217_s2 }
  0x35   :  { %p151_p9 = pnand %p149_p8, %p146_p7 }
  0x37   :  { %154 = shalt.err (!%p151_p9)
}
  0x38   :  { %79 = dma.vmem_to_hbm [thread:$0]  %s77_s5, 512, %s217_s2, [#allocation4]  }
  0x39   :  { %159 = dma.done.wait [#allocation4], 512  }
  0x3a   :  { %160 = vsyncadd [#allocation4], 4294966784 }
  0x3b   :  { %83 = vsyncpa [#allocation3], 1 }
  0x3c   :  { %84 = vsyncpa [#allocation6], 1 }
  0x3d   :  { %85 = vsyncpa [#allocation4], 1 }

</bundles_post_ra>
